<compile_context>
chip_gen: v5e
topology: v5e:2x2
jax: 0.10.0
libtpu: 0.0.40
codegen_flags: <defaults>
</compile_context>

<pallas_src>
import functools

import jax
import jax.numpy as jnp
from jax.experimental import pallas as pl
from jax.experimental.pallas import tpu as pltpu


def linproj_kernel(x_ref, gamma_ref, beta_ref, w_ref, cls_ref, emb_ref,
                   out_ref, *, n_batch, seq_len):
    """Fused BatchNorm1d(F) + Linear(F->D) + cls prepend + pos-embedding add.

    x_ref:     [R, F]    flattened input rows, R = B*T, F = N*C (unpadded)
    gamma_ref: [1, F]    BN scale
    beta_ref:  [1, F]    BN shift
    w_ref:     [F, D]    Linear weight, pre-transposed (nn.Linear is [D, F])
    cls_ref:   [1, D]    cls token
    emb_ref:   [T+1, D]  position-embedding table (max_norm=1.0 semantics)
    out_ref:   [B, T+1, D]  final output, written fully in-kernel
    """
    x = x_ref[...]                                            # [R, F]
    n_rows = x.shape[0]
    inv_n = jnp.float32(1.0 / n_rows)

    # --- Training-mode batch statistics over all rows (biased variance).
    # Two-pass on the VMEM-resident block: numerically matches the reference
    # and costs only one extra R*F subtract that is reused below.
    mean = jnp.sum(x, axis=0, keepdims=True) * inv_n          # [1, F]
    xc = x - mean                                             # [R, F]
    var = jnp.sum(xc * xc, axis=0, keepdims=True) * inv_n     # [1, F]
    inv_std = jax.lax.rsqrt(var + 1e-5)                       # EUP slot

    # --- Normalize + affine, then one MXU projection (no separate bias dot).
    x_norm = xc * (inv_std * gamma_ref[...]) + beta_ref[...]  # [R, F]
    y = jnp.dot(x_norm, w_ref[...],
                preferred_element_type=jnp.float32)           # [R, D]

    # --- Position embedding with nn.Embedding(max_norm=1.0) lookup renorm:
    # rows with L2 norm > 1 are rescaled by 1/(norm + 1e-7).
    emb = emb_ref[...]                                        # [T+1, D]
    nrm = jnp.sqrt(jnp.sum(emb * emb, axis=-1, keepdims=True))
    pos = jnp.where(nrm > 1.0, emb / (nrm + 1e-7), emb)       # [T+1, D]

    row0 = cls_ref[...] + pos[0:1, :]                         # [1, D]  cls+pos0
    pos_rest = pos[1:, :]                                     # [T, D]

    # --- Scatter into the final [B, T+1, D] layout (B is a small static
    # constant, so this unrolls to a handful of windowed stores).
    for b in range(n_batch):
        out_ref[b, 0:1, :] = row0
        out_ref[b, 1:, :] = y[b * seq_len:(b + 1) * seq_len, :] + pos_rest


def linear_projection(X_in, gamma, beta, W_lo, x_cls, emb_weight):
    """X_in: [B, T, N, C] float32; W_lo: [D, F] (nn.Linear weight layout)."""
    B, T, N, C = X_in.shape
    F = N * C
    D = W_lo.shape[0]
    R = B * T

    # Only free / tiny wrapper ops: a contiguous flatten of x and a transpose
    # of the small weight.  No padding, no epilogue.
    x_flat = X_in.reshape(R, F).astype(jnp.float32)           # [R, F]
    w = W_lo.T.astype(jnp.float32)                            # [F, D]
    gamma2 = gamma.reshape(1, F).astype(jnp.float32)
    beta2 = beta.reshape(1, F).astype(jnp.float32)
    cls2 = x_cls.reshape(1, D).astype(jnp.float32)
    emb2 = emb_weight.astype(jnp.float32)                     # [T+1, D]

    vmem = pl.BlockSpec(memory_space=pltpu.MemorySpace.VMEM)
    return pl.pallas_call(
        functools.partial(linproj_kernel, n_batch=B, seq_len=T),
        out_shape=jax.ShapeDtypeStruct((B, T + 1, D), jnp.float32),
        in_specs=[vmem] * 6,
        out_specs=vmem,
    )(x_flat, gamma2, beta2, w, cls2, emb2)


def linear_projection_ref(X_in, gamma, beta, W_lo, x_cls, emb_weight):
    """Pure-JAX reference mirroring the PyTorch module."""
    B, T, N, C = X_in.shape
    F = N * C
    D = W_lo.shape[0]
    x = X_in.reshape(B, T, F).astype(jnp.float32)
    # BatchNorm1d(F) on [B, F, T] == per-feature stats over (B, T), biased var.
    mean = jnp.mean(x, axis=(0, 1), keepdims=True)
    var = jnp.mean((x - mean) ** 2, axis=(0, 1), keepdims=True)
    x_norm = (x - mean) / jnp.sqrt(var + 1e-5) * gamma + beta
    x_lo = jnp.einsum("btf,df->btd", x_norm, W_lo)
    norm = jnp.linalg.norm(emb_weight, axis=-1, keepdims=True)
    pos = jnp.where(norm > 1.0, emb_weight / (norm + 1e-7), emb_weight)
    cls = jnp.broadcast_to(x_cls.reshape(1, 1, D), (B, 1, D))
    return jnp.concatenate([cls, x_lo], axis=1) + pos[None, :, :]


if __name__ == "__main__":
    # Small shapes consistent with the module: B=2, T=5, N=17, C=3, D_model=64
    B, T, N, C, D = 2, 5, 17, 3, 64
    F = N * C

    key = jax.random.PRNGKey(0)
    k_x, k_w, k_cls, k_emb, k_g, k_b = jax.random.split(key, 6)

    X_in = jax.random.normal(k_x, (B, T, N, C), dtype=jnp.float32)
    # Non-trivial BN affine to exercise the in-kernel normalization path.
    gamma = 1.0 + 0.1 * jax.random.normal(k_g, (F,), jnp.float32)   # BN weight
    beta = 0.1 * jax.random.normal(k_b, (F,), jnp.float32)          # BN bias
    W_lo = 0.05 * jax.random.normal(k_w, (D, F), jnp.float32)       # Linear weight [out,in]
    x_cls = jax.random.normal(k_cls, (1, D), jnp.float32)           # cls token
    emb_w = jax.random.normal(k_emb, (T + 1, D), jnp.float32)       # embedding table

    fwd = jax.jit(linear_projection)
    out = jax.block_until_ready(fwd(X_in, gamma, beta, W_lo, x_cls, emb_w))

    ref = linear_projection_ref(X_in, gamma, beta, W_lo, x_cls, emb_w)
    assert out.shape == (B, T + 1, D)
    assert jnp.allclose(out, ref, atol=1e-4, rtol=1e-4), "mismatch vs reference"

    print("KERNEL_OK")
</pallas_src>

<mosaic_0001>
module attributes {stable_mosaic.version = 11 : i64} {
  func.func @linproj_kernel(%arg0: memref<10x51xf32, #tpu.memory_space<vmem>>, %arg1: memref<1x51xf32, #tpu.memory_space<vmem>>, %arg2: memref<1x51xf32, #tpu.memory_space<vmem>>, %arg3: memref<51x64xf32, #tpu.memory_space<vmem>>, %arg4: memref<1x64xf32, #tpu.memory_space<vmem>>, %arg5: memref<6x64xf32, #tpu.memory_space<vmem>>, %arg6: memref<2x6x64xf32, #tpu.memory_space<vmem>>) attributes {dimension_semantics = [], scalar_prefetch = 0 : i64, scratch_operands = 0 : i64, tpu.core_type = #tpu.core_type<tc>} {
    %c0 = arith.constant 0 : index
    %c0_0 = arith.constant 0 : index
    %0 = vector.load %arg0[%c0, %c0_0] : memref<10x51xf32, #tpu.memory_space<vmem>>, vector<10x51xf32>
    %cst = arith.constant dense<0.000000e+00> : vector<51xf32>
    %1 = vector.multi_reduction <add>, %0, %cst [0] : vector<10x51xf32> to vector<51xf32>
    %2 = vector.shape_cast %1 : vector<51xf32> to vector<1x51xf32>
    %cst_1 = arith.constant 1.000000e-01 : f32
    %3 = vector.broadcast %cst_1 : f32 to vector<1x51xf32>
    %4 = arith.mulf %2, %3 : vector<1x51xf32>
    %5 = vector.broadcast %4 : vector<1x51xf32> to vector<10x51xf32>
    %6 = arith.subf %0, %5 : vector<10x51xf32>
    %7 = arith.mulf %6, %6 : vector<10x51xf32>
    %cst_2 = arith.constant dense<0.000000e+00> : vector<51xf32>
    %8 = vector.multi_reduction <add>, %7, %cst_2 [0] : vector<10x51xf32> to vector<51xf32>
    %9 = vector.shape_cast %8 : vector<51xf32> to vector<1x51xf32>
    %cst_3 = arith.constant 1.000000e-01 : f32
    %10 = vector.broadcast %cst_3 : f32 to vector<1x51xf32>
    %11 = arith.mulf %9, %10 : vector<1x51xf32>
    %cst_4 = arith.constant 9.99999974E-6 : f32
    %12 = vector.broadcast %cst_4 : f32 to vector<1x51xf32>
    %13 = arith.addf %11, %12 : vector<1x51xf32>
    %14 = math.rsqrt %13 : vector<1x51xf32>
    %c0_5 = arith.constant 0 : index
    %c0_6 = arith.constant 0 : index
    %15 = vector.load %arg1[%c0_5, %c0_6] : memref<1x51xf32, #tpu.memory_space<vmem>>, vector<1x51xf32>
    %16 = arith.mulf %14, %15 : vector<1x51xf32>
    %17 = vector.broadcast %16 : vector<1x51xf32> to vector<10x51xf32>
    %18 = arith.mulf %6, %17 : vector<10x51xf32>
    %c0_7 = arith.constant 0 : index
    %c0_8 = arith.constant 0 : index
    %19 = vector.load %arg2[%c0_7, %c0_8] : memref<1x51xf32, #tpu.memory_space<vmem>>, vector<1x51xf32>
    %20 = vector.broadcast %19 : vector<1x51xf32> to vector<10x51xf32>
    %21 = arith.addf %18, %20 : vector<10x51xf32>
    %c0_9 = arith.constant 0 : index
    %c0_10 = arith.constant 0 : index
    %22 = vector.load %arg3[%c0_9, %c0_10] : memref<51x64xf32, #tpu.memory_space<vmem>>, vector<51x64xf32>
    %cst_11 = arith.constant dense<0.000000e+00> : vector<10x64xf32>
    %23 = tpu.matmul %21, %22, %cst_11 {dimension_numbers = #tpu.dot_dimension_numbers<[1], [0], [0], [1], [0, 0, 1, 1], [], []>} : vector<10x51xf32>, vector<51x64xf32>, vector<10x64xf32> -> vector<10x64xf32>
    %c0_12 = arith.constant 0 : index
    %c0_13 = arith.constant 0 : index
    %24 = vector.load %arg5[%c0_12, %c0_13] : memref<6x64xf32, #tpu.memory_space<vmem>>, vector<6x64xf32>
    %25 = arith.mulf %24, %24 : vector<6x64xf32>
    %cst_14 = arith.constant dense<0.000000e+00> : vector<6xf32>
    %26 = vector.multi_reduction <add>, %25, %cst_14 [1] : vector<6x64xf32> to vector<6xf32>
    %27 = vector.shape_cast %26 : vector<6xf32> to vector<6x1xf32>
    %28 = math.sqrt %27 : vector<6x1xf32>
    %cst_15 = arith.constant 1.000000e+00 : f32
    %29 = vector.broadcast %cst_15 : f32 to vector<6x1xf32>
    %30 = arith.cmpf ogt, %28, %29 : vector<6x1xf32>
    %cst_16 = arith.constant 1.000000e-07 : f32
    %31 = vector.broadcast %cst_16 : f32 to vector<6x1xf32>
    %32 = arith.addf %28, %31 : vector<6x1xf32>
    %33 = vector.broadcast %32 : vector<6x1xf32> to vector<6x64xf32>
    %34 = arith.divf %24, %33 : vector<6x64xf32>
    %35 = vector.shape_cast %30 : vector<6x1xi1> to vector<6x1xi1>
    %36 = vector.broadcast %35 : vector<6x1xi1> to vector<6x64xi1>
    %37 = arith.select %36, %34, %24 : vector<6x64xi1>, vector<6x64xf32>
    %c0_17 = arith.constant 0 : index
    %c0_18 = arith.constant 0 : index
    %38 = vector.load %arg4[%c0_17, %c0_18] : memref<1x64xf32, #tpu.memory_space<vmem>>, vector<1x64xf32>
    %39 = vector.extract_strided_slice %37 {offsets = [0, 0], sizes = [1, 64], strides = [1, 1]} : vector<6x64xf32> to vector<1x64xf32>
    %40 = arith.addf %38, %39 : vector<1x64xf32>
    %41 = vector.extract_strided_slice %37 {offsets = [1, 0], sizes = [5, 64], strides = [1, 1]} : vector<6x64xf32> to vector<5x64xf32>
    %c0_19 = arith.constant 0 : index
    %c0_20 = arith.constant 0 : index
    %c0_21 = arith.constant 0 : index
    %42 = vector.load %arg6[%c0_19, %c0_20, %c0_21] : memref<2x6x64xf32, #tpu.memory_space<vmem>>, vector<1x1x64xf32>
    %43 = vector.shape_cast %42 : vector<1x1x64xf32> to vector<1x64xf32>
    %44 = vector.shape_cast %40 : vector<1x64xf32> to vector<1x1x64xf32>
    tpu.vector_store %arg6[%c0_19, %c0_20, %c0_21], %44 {strides = array<i32>} : memref<2x6x64xf32, #tpu.memory_space<vmem>>, vector<1x1x64xf32>,
    %45 = vector.extract_strided_slice %23 {offsets = [0, 0], sizes = [5, 64], strides = [1, 1]} : vector<10x64xf32> to vector<5x64xf32>
    %46 = arith.addf %45, %41 : vector<5x64xf32>
    %c0_22 = arith.constant 0 : index
    %c1 = arith.constant 1 : index
    %c0_23 = arith.constant 0 : index
    %47 = vector.load %arg6[%c0_22, %c1, %c0_23] : memref<2x6x64xf32, #tpu.memory_space<vmem>>, vector<1x5x64xf32>
    %48 = vector.shape_cast %47 : vector<1x5x64xf32> to vector<5x64xf32>
    %49 = vector.shape_cast %46 : vector<5x64xf32> to vector<1x5x64xf32>
    tpu.vector_store %arg6[%c0_22, %c1, %c0_23], %49 {strides = array<i32>} : memref<2x6x64xf32, #tpu.memory_space<vmem>>, vector<1x5x64xf32>,
    %c1_24 = arith.constant 1 : index
    %c0_25 = arith.constant 0 : index
    %c0_26 = arith.constant 0 : index
    %50 = vector.load %arg6[%c1_24, %c0_25, %c0_26] : memref<2x6x64xf32, #tpu.memory_space<vmem>>, vector<1x1x64xf32>
    %51 = vector.shape_cast %50 : vector<1x1x64xf32> to vector<1x64xf32>
    %52 = vector.shape_cast %40 : vector<1x64xf32> to vector<1x1x64xf32>
    tpu.vector_store %arg6[%c1_24, %c0_25, %c0_26], %52 {strides = array<i32>} : memref<2x6x64xf32, #tpu.memory_space<vmem>>, vector<1x1x64xf32>,
    %53 = vector.extract_strided_slice %23 {offsets = [5, 0], sizes = [5, 64], strides = [1, 1]} : vector<10x64xf32> to vector<5x64xf32>
    %54 = arith.addf %53, %41 : vector<5x64xf32>
    %c1_27 = arith.constant 1 : index
    %c1_28 = arith.constant 1 : index
    %c0_29 = arith.constant 0 : index
    %55 = vector.load %arg6[%c1_27, %c1_28, %c0_29] : memref<2x6x64xf32, #tpu.memory_space<vmem>>, vector<1x5x64xf32>
    %56 = vector.shape_cast %55 : vector<1x5x64xf32> to vector<5x64xf32>
    %57 = vector.shape_cast %54 : vector<5x64xf32> to vector<1x5x64xf32>
    tpu.vector_store %arg6[%c1_27, %c1_28, %c0_29], %57 {strides = array<i32>} : memref<2x6x64xf32, #tpu.memory_space<vmem>>, vector<1x5x64xf32>,
    return
  }
}

</mosaic_0001>

<bundles_post_ra>
// kernel: linear_projection.1
= control target key start
LH: loop header
LB: loop body
LE: loop exit
PB: predicated region body
PF: predicated region fallthrough
CT: control target
= control target key end

     0   :  { %vm115_vm0 = vcmask 521216   ;;  %vm86_vm1 = vcmask 1042432   ;;  %vm25_vm2 = vcmask 416768   ;;  %vm27_vm3 = vcmask 410624   ;;  %s296_s5 = inlined_call_operand.vmem [shape: f32[6,64], index: 5, kind: input, shape index: {}]   ;;  %s297_s3 = inlined_call_operand.vmem [shape: f32[51,64], index: 3, kind: input, shape index: {}]   ;;  %s298_s0 = inlined_call_operand.vmem [shape: f32[10,51], index: 0, kind: input, shape index: {}]   ;;  %s299_s2 = inlined_call_operand.vmem [shape: f32[1,51], index: 2, kind: input, shape index: {}]   ;;  %s300_s1 = inlined_call_operand.vmem [shape: f32[1,51], index: 1, kind: input, shape index: {}]   ;;  %s301_s4 = inlined_call_operand.vmem [shape: f32[1,64], index: 4, kind: input, shape index: {}]   ;;  %s302_s6 = inlined_call_operand.vmem [shape: f32[2,6,64], index: 6, kind: output, shape index: {}]  }
   0x1   :  { %v233_v0 = vld [vmem:[%s296_s5] sm:$0x3f]  ;;  %v79_v1 = vld [vmem:[%s297_s3 + $0x30] sm:$0x7]  ;;  %v78_v2 = vld [vmem:[%s297_s3 + $0x28] sm:$0xff]  ;;  %vm153_vm14 = vcmask 516096  }
   0x2   :  { %v114_v3 = vmul.f32 %v233_v0, %v233_v0  ;;  %175 = vmatpush.msk.msra.mxu0 %vm86_vm1, %v79_v1  ;;  %181 = vmatpush.msk.msra.mxu1 %vm86_vm1, %v79_v1  ;;  %v77_v4 = vld [vmem:[%s297_s3 + $0x20] sm:$0xff]  ;;  %v24_v7 = vld [vmem:[%s298_s0 + $0x8] sm:$0x3]  ;;  %v76_v9 = vld [vmem:[%s297_s3 + $0x18] sm:$0xff]  ;;  %vm159_vm15 = vcmask 520192   ;;  %vm169_vm1 = vcmask 517120  }
   0x3   :  { %v23_v5 = vld [vmem:[%s298_s0] sm:$0xff]  ;;  %v28_v10 = vsel %vm27_vm3, %v24_v7, 0.0  ;;  %v75_v12 = vld [vmem:[%s297_s3 + $0x10] sm:$0xff]  ;;  %v74_v14 = vld [vmem:[%s297_s3 + $0x8] sm:$0xff] }
   0x4   :  { %v116_v6 = vsel %vm115_vm0, %v114_v3, 0.0  ;;  %100 = vmatpush.msra.mxu0 %v78_v2  ;;  %182 = vmatpush.msra.mxu1 %v78_v2  ;;  %v26_v8 = vsel %vm25_vm2, %v23_v5, 0.0  ;;  %v73_v16 = vld [vmem:[%s297_s3] sm:$0xff]  ;;  %vm167_vm0 = vcmask 523269  }
   0x5   :  { %117 = vadd.xlane.f32.xlu0 %v116_v6  ;;  %v29_v11 = vadd.f32 %v28_v10, %v26_v8  ;;  %v62_v43 = vld [vmem:[%s300_s1] sm:$0x1] }
   0x6   :  { %101 = vmatpush.msra.mxu0 %v77_v4  ;;  %183 = vmatpush.msra.mxu1 %v77_v4  ;;  %v188_v47 = vld [vmem:[%s299_s2] ss:$0 sm:$0xff] }
   0x7   :  { %v30_v13 = vrot.slane %v29_v11, 4 }
   0x8   :  { %102 = vmatpush.msra.mxu0 %v76_v9  ;;  %184 = vmatpush.msra.mxu1 %v76_v9 }
   0x9   :  { %v31_v15 = vadd.f32 %v30_v13, %v29_v11 }
   0xa   :  { %103 = vmatpush.msra.mxu0 %v75_v12  ;;  %185 = vmatpush.msra.mxu1 %v75_v12  ;;  %v151_v12 = vld [vmem:[%s301_s4] sm:$0x1] }
   0xb   :  { %v32_v17 = vrot.slane %v31_v15, 2 }
   0xc   :  { %104 = vmatpush.msra.mxu0 %v74_v14  ;;  %186 = vmatpush.msra.mxu1 %v74_v14 }
   0xd   :  { %v33_v18 = vadd.f32 %v32_v17, %v31_v15 }
   0xe   :  { %105 = vmatpush.msra.mxu0 %v73_v16  ;;  %187 = vmatpush.msra.mxu1 %v73_v16 }
   0xf   :  { %v34_v19 = vrot.slane %v33_v18, 1 }
  0x11   :  { %v35_v20 = vadd.f32 %v34_v19, %v33_v18 }
  0x13   :  { %v36_v21 = vmul.f32 0.1, %v35_v20 }
  0x15   :  { %v37_v22 = vsub.f32 %v23_v5, %v36_v21  ;;  %v38_v23 = vsub.f32 %v24_v7, %v36_v21 }
  0x17   :  { %v39_v24 = vmul.f32 %v37_v22, %v37_v22  ;;  %v40_v25 = vmul.f32 %v38_v23, %v38_v23 }
  0x19   :  { %v41_v26 = vsel %vm25_vm2, %v39_v24, 0.0  ;;  %v42_v27 = vsel %vm27_vm3, %v40_v25, 0.0 }
  0x1a   :  { %v43_v28 = vadd.f32 %v42_v27, %v41_v26 }
  0x1c   :  { %v44_v29 = vrot.slane %v43_v28, 4 }
  0x1e   :  { %v45_v30 = vadd.f32 %v44_v29, %v43_v28 }
  0x20   :  { %v46_v31 = vrot.slane %v45_v30, 2 }
  0x22   :  { %v47_v32 = vadd.f32 %v46_v31, %v45_v30 }
  0x24   :  { %v48_v33 = vrot.slane %v47_v32, 1 }
  0x26   :  { %v49_v34 = vadd.f32 %v48_v33, %v47_v32 }
  0x28   :  { %v50_v35 = vmul.f32 0.1, %v49_v34 }
  0x2a   :  { %v51_v36 = vadd.f32 1e-05, %v50_v35 }
  0x2c   :  { %189 = vrsqrt.f32 %v51_v36  ;;  %vm58_vm4 = vweird.f32 %v51_v36 }
  0x32   :  { %v190_v37 = vpop.eup %189 }
  0x33   :  { %v53_v38 = vmul.f32 %v190_v37, %v51_v36  ;;  %vm59_vm5 = vweird.f32 %v190_v37 }
  0x34   :  { %vm60_vm6 = vmor %vm58_vm4, %vm59_vm5 }
  0x35   :  { %v54_v39 = vmul.f32 %v190_v37, %v53_v38 }
  0x37   :  { %v55_v40 = vmul.f32 0.5, %v54_v39 }
  0x39   :  { %v56_v41 = vsub.f32 1.5, %v55_v40 }
  0x3b   :  { %v57_v42 = vmul.f32 %v190_v37, %v56_v41 }
  0x3d   :  { %v61_v44 = vsel %vm60_vm6, %v190_v37, %v57_v42 }
  0x3e   :  { %v63_v45 = vmul.f32 %v62_v43, %v61_v44 }
  0x40   :  { %v64_v46 = vperm.slane %v63_v45, 0 }
  0x42   :  { %v65_v48 = vmul.f32 %v64_v46, %v37_v22  ;;  %v66_v49 = vmul.f32 %v64_v46, %v38_v23 }
  0x44   :  { %v71_v50 = vadd.f32 %v188_v47, %v65_v48  ;;  %v72_v51 = vadd.f32 %v188_v47, %v66_v49 }
  0x46   :  { %176 = vmatmul.msk.f32.vlgmr.msra.gmra.mxu0 %vm25_vm2, %v71_v50  ;;  %177 = vmatmul.msk.f32.vlgmr.msra.gmra.mxu1 %vm25_vm2, %v72_v51 }
  0x78   :  { %v118_v52 = vpop.xlane.xlu0 %117 }
  0x79   :  { %191 = vrsqrt.f32 %v118_v52  ;;  %vm126_vm7 = vcmp.eq.f32.partialorder %v118_v52, inf  ;;  %v129_v59 = vand.u32 2147483648, %v118_v52  ;;  %vm128_vm8 = vcmp.eq.f32.partialorder %v118_v52, 0.0 }
  0x7f   :  { %v192_v53 = vpop.eup %191 }
  0x80   :  { %v120_v54 = vmul.f32 %v192_v53, %v118_v52 }
  0x82   :  { %v121_v55 = vmul.f32 %v192_v53, %v120_v54 }
  0x84   :  { %v122_v56 = vmul.f32 0.5, %v121_v55 }
  0x86   :  { %v123_v57 = vsub.f32 1.5, %v122_v56 }
  0x88   :  { %v124_v58 = vmul.f32 %v192_v53, %v123_v57 }
  0x8a   :  { %v125_v60 = vmul.f32 %v124_v58, %v118_v52 }
  0x8c   :  { %v127_v61 = vsel %vm126_vm7, %v118_v52, %v125_v60 }
  0x8d   :  { %v130_v62 = vsel %vm128_vm8, %v129_v59, %v127_v61 }
  0x8e   :  { %v132_v63 = vadd.f32 1e-07, %v130_v62  ;;  %vm131_vm13 = vcmp.gt.f32.partialorder %v130_v62, 1.0 }
  0x90   :  { %193 = vrcp.f32 %v132_v63  ;;  %v144_v4 = vand.u32 2147483648, %v132_v63  ;;  %vm138_vm9 = vweird.f32 %v132_v63  ;;  %v142_v6 = vand.u32 2147483647, %v132_v63 }
  0x92   :  { %v145_v8 = vor.u32 1.1754944e-38, %v144_v4  ;;  %vm143_vm12 = vcmp.eq.f32.partialorder %v142_v6, 8.507059e+37 }
  0x96   :  { %v194_v1 = vpop.eup %193 }
  0x97   :  { %v134_v2 = vmul.f32 %v194_v1, %v132_v63  ;;  %vm139_vm10 = vweird.f32 %v194_v1 }
  0x98   :  { %vm140_vm11 = vmor %vm138_vm9, %vm139_vm10 }
  0x99   :  { %v135_v3 = vsub.f32 1.0, %v134_v2 }
  0x9b   :  { %v136_v5 = vmul.f32 %v194_v1, %v135_v3 }
  0x9d   :  { %v137_v7 = vadd.f32 %v194_v1, %v136_v5 }
  0x9f   :  { %v141_v9 = vsel %vm140_vm11, %v194_v1, %v137_v7 }
  0xa0   :  { %v146_v10 = vsel %vm143_vm12, %v145_v8, %v141_v9 }
  0xa1   :  { %v147_v11 = vmul.f32 %v146_v10, %v233_v0 }
  0xa3   :  { %v150_v13 = vsel %vm131_vm13, %v147_v11, %v233_v0 }
  0xa4   :  { %v152_v14 = vadd.f32 %v151_v12, %v150_v13  ;;  %v156_v15 = vrot.slane %v150_v13, 1  ;;  %v163_v16 = vrot.slane %v150_v13, 4 }
  0xa6   :  { %154 = vst.msk [vmem:[%s302_s6] sm:$0x1] %vm153_vm14, %v152_v14 }
  0xa7   :  { %178 = vst.msk [vmem:[%s302_s6 + $0x8] sm:$0x1] %vm153_vm14, %v152_v14 }
  0xc3   :  { %v107_v17 = vpop.f32.mrf.mxu0  ;;  %v110_v18 = vpop.f32.mrf.mxu1 }
  0xc4   :  { %v158_v19 = vadd.f32 %v156_v15, %v107_v17  ;;  %v165_v20 = vadd.f32 %v163_v16, %v107_v17  ;;  %v166_v21 = vadd.f32 %v163_v16, %v110_v18 }
  0xc6   :  { %160 = vst.msk [vmem:[%s302_s6 + $0x1] sm:$0x1f] %vm159_vm15, %v158_v19 }
  0xc7   :  { %179 = vst.msk [vmem:[%s302_s6 + $0x4] sm:$0xe0] %vm167_vm0, %v165_v20 }
  0xc8   :  { %180 = vst.msk [vmem:[%s302_s6 + $0xc] sm:$0x3] %vm169_vm1, %v166_v21 }

</bundles_post_ra>
